<compile_context>
chip_gen: v7x
topology: tpu7x:2x2x1
jax: 0.10.0
libtpu: 0.0.40
codegen_flags: <defaults>
</compile_context>

<pallas_src>
import math

import jax
import jax.numpy as jnp
from jax.experimental import pallas as pl
from jax.experimental.pallas import tpu as pltpu


def _round_up(x, m):
    return (x + m - 1) // m * m


def _vmem_capacity_bytes():
    try:
        return int(pltpu.get_tpu_info().vmem_capacity_bytes)
    except Exception:
        return 64 << 20  # conservative fallback: v7x per-TensorCore VMEM


# ----------------------------------------------------------------------------
# Kernel 1: MLP head in transposed layout.
#   H0^T = W2^T relu(W1^T X^T + b1) + b2      shapes: (C_pad, tn) per tile
# ----------------------------------------------------------------------------
def _mlp_kernel(x_ref, w1_ref, b1_ref, w2_ref, b2_ref, o_ref):
    h = jnp.dot(w1_ref[...], x_ref[...],
                preferred_element_type=jnp.float32) + b1_ref[...]
    h = jnp.maximum(h, 0.0)                                   # ReLU (f32 on VPU)
    o = jnp.dot(w2_ref[...], h.astype(jnp.bfloat16),
                preferred_element_type=jnp.float32) + b2_ref[...]
    o_ref[...] = o.astype(o_ref.dtype)


def mlp_forward_t(x, w1, b1, w2, b2, *, n_pad, tn):
    """Returns H0 in transposed layout: (C_pad, n_pad) float32."""
    N, F = x.shape
    HID = w1.shape[1]
    C = w2.shape[1]
    F_pad = _round_up(F, 16)        # bf16 sublane packing = 16
    HID_pad = _round_up(HID, 16)
    C_pad = _round_up(C, 16)

    x_t = jnp.zeros((F_pad, n_pad), jnp.bfloat16).at[:F, :N].set(
        x.T.astype(jnp.bfloat16))
    w1_t = jnp.zeros((HID_pad, F_pad), jnp.bfloat16).at[:HID, :F].set(
        w1.T.astype(jnp.bfloat16))
    b1_c = jnp.zeros((HID_pad, 1), jnp.float32).at[:HID, 0].set(b1)
    w2_t = jnp.zeros((C_pad, HID_pad), jnp.bfloat16).at[:C, :HID].set(
        w2.T.astype(jnp.bfloat16))
    b2_c = jnp.zeros((C_pad, 1), jnp.float32).at[:C, 0].set(b2)

    return pl.pallas_call(
        _mlp_kernel,
        out_shape=jax.ShapeDtypeStruct((C_pad, n_pad), jnp.float32),
        grid=(n_pad // tn,),
        in_specs=[
            pl.BlockSpec((F_pad, tn), lambda j: (0, j)),
            pl.BlockSpec((HID_pad, F_pad), lambda j: (0, 0)),
            pl.BlockSpec((HID_pad, 1), lambda j: (0, 0)),
            pl.BlockSpec((C_pad, HID_pad), lambda j: (0, 0)),
            pl.BlockSpec((C_pad, 1), lambda j: (0, 0)),
        ],
        out_specs=pl.BlockSpec((C_pad, tn), lambda j: (0, j)),
        compiler_params=pltpu.CompilerParams(
            dimension_semantics=("parallel",)),
    )(x_t, w1_t, b1_c, w2_t, b2_c)


# ----------------------------------------------------------------------------
# Kernel 2a: propagation with A_hat^T resident in VMEM (single-buffered, DMA'd
# once at k==0 from HBM via memory_space=pl.ANY).  grid=(K,).
# ----------------------------------------------------------------------------
def _dagnn_prop_resident_kernel(h0_ref, a_hbm, ws_ref, bs_ref, o_ref,
                                a_vmem, a_sem, h_carry):
    k = pl.program_id(0)

    def score(h):  # (C_pad, n_pad) f32 -> (1, n_pad); VPU mul + sublane reduce
        z = jnp.sum(ws_ref[...] * h, axis=0, keepdims=True) + bs_ref[...]
        return jax.nn.sigmoid(z)

    @pl.when(k == 0)
    def _():
        cp = pltpu.make_async_copy(a_hbm, a_vmem, a_sem)   # single-buffered A
        cp.start()
        h0 = h0_ref[...]
        h_carry[...] = h0.astype(jnp.bfloat16)
        o_ref[...] = score(h0) * h0
        cp.wait()

    h_new = jnp.dot(h_carry[...], a_vmem[...],
                    preferred_element_type=jnp.float32)
    o_ref[...] += score(h_new) * h_new
    h_carry[...] = h_new.astype(jnp.bfloat16)


def dagnn_prop_resident(h0_t, a_t_bf16, w_s, b_s, K, *, C, vmem_cap):
    C_pad, n_pad = h0_t.shape
    ws_c = jnp.zeros((C_pad, 1), jnp.float32).at[:C, 0].set(w_s[:, 0])
    bs_c = jnp.asarray(b_s, jnp.float32).reshape(1, 1)

    a_bytes = a_t_bf16.size * a_t_bf16.dtype.itemsize
    h_bytes = C_pad * n_pad * 4
    need = a_bytes + 8 * h_bytes + (4 << 20)
    vmem_limit = int(min(vmem_cap - (8 << 20), max(32 << 20, need)))

    return pl.pallas_call(
        _dagnn_prop_resident_kernel,
        out_shape=jax.ShapeDtypeStruct((C_pad, n_pad), jnp.float32),
        grid=(K,),
        in_specs=[
            pl.BlockSpec((C_pad, n_pad), lambda k: (0, 0)),
            pl.BlockSpec(memory_space=pl.ANY),            # A^T stays in HBM
            pl.BlockSpec((C_pad, 1), lambda k: (0, 0)),
            pl.BlockSpec((1, 1), lambda k: (0, 0)),
        ],
        out_specs=pl.BlockSpec((C_pad, n_pad), lambda k: (0, 0)),
        scratch_shapes=[
            pltpu.VMEM((n_pad, n_pad), jnp.bfloat16),     # A^T, single buffer
            pltpu.SemaphoreType.DMA,
            pltpu.VMEM((C_pad, n_pad), jnp.bfloat16),     # carried H_k (bf16)
        ],
        compiler_params=pltpu.CompilerParams(
            dimension_semantics=("arbitrary",),
            vmem_limit_bytes=vmem_limit),
    )(h0_t, a_t_bf16, ws_c, bs_c)


# ----------------------------------------------------------------------------
# Kernel 2b: propagation with A_hat^T streamed as big column panels (n_pad, tc).
#   grid=(K, J): per step  H_{k+1}[:, panel j] = H_k @ A^T[:, panel j]
#   Carried H lives in a bf16 ping-pong scratch (2, C_pad, n_pad); output is a
#   resident (C_pad, n_pad) f32 block.  Both axes MUST stay "arbitrary".
# ----------------------------------------------------------------------------
def _dagnn_prop_streamed_kernel(h0_ref, a_ref, ws_ref, bs_ref, o_ref, h_buf):
    k = pl.program_id(0)
    j = pl.program_id(1)
    tc = a_ref.shape[1]
    col = pl.multiple_of(j * tc, 128)

    def score(h):  # (C_pad, tc) f32 -> (1, tc)
        z = jnp.sum(ws_ref[...] * h, axis=0, keepdims=True) + bs_ref[...]
        return jax.nn.sigmoid(z)

    # k == 0 bootstrap: load H0 into the ping buffer, emit the k=0 output term.
    @pl.when((k == 0) & (j == 0))
    def _():
        h_buf[0, :, :] = h0_ref[...].astype(jnp.bfloat16)

    @pl.when(k == 0)
    def _():
        h0j = h0_ref[:, pl.ds(col, tc)]
        o_ref[:, pl.ds(col, tc)] = score(h0j) * h0j

    cur = jax.lax.rem(k, 2)
    h_new = jnp.dot(h_buf[cur], a_ref[...],
                    preferred_element_type=jnp.float32)      # (C_pad, tc) f32
    o_ref[:, pl.ds(col, tc)] += score(h_new) * h_new

    h_new_bf = h_new.astype(jnp.bfloat16)

    @pl.when(cur == 0)
    def _():
        h_buf[1, :, pl.ds(col, tc)] = h_new_bf

    @pl.when(cur == 1)
    def _():
        h_buf[0, :, pl.ds(col, tc)] = h_new_bf


def dagnn_prop_streamed(h0_t, a_t_bf16, w_s, b_s, K, *, C, vmem_cap, tc=None):
    C_pad, n_pad = h0_t.shape
    if tc is None:
        budget = max(vmem_cap // 3, 8 << 20)      # double-buffered bf16 panel budget
        tc = (budget // (4 * n_pad)) // 128 * 128
    tc = int(min(max(tc, 128), n_pad))
    while n_pad % tc != 0:                        # n_pad is a multiple of 128
        tc -= 128
    J = n_pad // tc

    ws_c = jnp.zeros((C_pad, 1), jnp.float32).at[:C, 0].set(w_s[:, 0])
    bs_c = jnp.asarray(b_s, jnp.float32).reshape(1, 1)

    h_bytes = C_pad * n_pad * 4
    need = 4 * n_pad * tc + 8 * h_bytes + (4 << 20)
    vmem_limit = int(min(vmem_cap - (8 << 20), max(32 << 20, need)))

    return pl.pallas_call(
        _dagnn_prop_streamed_kernel,
        out_shape=jax.ShapeDtypeStruct((C_pad, n_pad), jnp.float32),
        grid=(K, J),
        in_specs=[
            pl.BlockSpec((C_pad, n_pad), lambda k, j: (0, 0)),
            pl.BlockSpec((n_pad, tc), lambda k, j: (0, j)),  # streamed A^T panel
            pl.BlockSpec((C_pad, 1), lambda k, j: (0, 0)),
            pl.BlockSpec((1, 1), lambda k, j: (0, 0)),
        ],
        out_specs=pl.BlockSpec((C_pad, n_pad), lambda k, j: (0, 0)),
        scratch_shapes=[pltpu.VMEM((2, C_pad, n_pad), jnp.bfloat16)],  # ping/pong H
        compiler_params=pltpu.CompilerParams(
            dimension_semantics=("arbitrary", "arbitrary"),
            vmem_limit_bytes=vmem_limit),
    )(h0_t, a_t_bf16, ws_c, bs_c)


# ----------------------------------------------------------------------------
# Glue: A_hat^T construction, parameter init, full forward, reference.
# ----------------------------------------------------------------------------
def build_a_hat_t(edge_index, num_nodes, n_pad, edge_weight=None):
    """A_hat^T = (D^{-1/2}(A+I)D^{-1/2})^T built directly at padded size (bf16).

    A[dst, src] += w (messages flow src -> dst); the transpose is scattered
    directly, so no extra N^2 transpose/copy buffers are materialized.
    """
    # TODO(synk): self-loops already present in edge_index are double-counted
    # relative to PyG's add_self_loops-with-dedup (minor semantic mismatch).
    src, dst = edge_index[0], edge_index[1]
    if edge_weight is None:
        w = jnp.ones(src.shape[0], jnp.float32)
    else:
        w = edge_weight.astype(jnp.float32)
    at = jnp.zeros((n_pad, n_pad), jnp.float32).at[src, dst].add(w)
    diag = jnp.arange(num_nodes)
    at = at.at[diag, diag].add(1.0)                     # self-loops
    deg = at.sum(axis=0)                                # row sums of A
    dinv = jnp.where(deg > 0.0, 1.0 / jnp.sqrt(deg), 0.0)
    return (dinv[:, None] * at * dinv[None, :]).astype(jnp.bfloat16)


def init_linear(key, fan_in, fan_out):
    kw, kb = jax.random.split(key)
    bound = 1.0 / math.sqrt(fan_in)
    w = jax.random.uniform(kw, (fan_in, fan_out), jnp.float32, -bound, bound)
    b = jax.random.uniform(kb, (fan_out,), jnp.float32, -bound, bound)
    return w, b


def dagnn_forward(x, edge_index, params, K, *, mode="auto", edge_weight=None,
                  tc=None):
    """Full DAGNN forward. Returns (N, out_channels) float32."""
    assert K >= 1
    w1, b1, w2, b2, w_s, b_s = params
    N = x.shape[0]
    C = w2.shape[1]
    C_pad = _round_up(C, 16)
    n_pad = _round_up(N, 512)                 # node axis on lanes; big MLP tiles
    vmem_cap = _vmem_capacity_bytes()

    tn_mlp = 1024 if n_pad % 1024 == 0 else 512
    h0_t = mlp_forward_t(x, w1, b1, w2, b2, n_pad=n_pad, tn=tn_mlp)  # (C_pad, n_pad)

    a_t = build_a_hat_t(edge_index, N, n_pad, edge_weight)           # bf16 A_hat^T

    a_bytes = a_t.size * a_t.dtype.itemsize
    h_bytes = C_pad * n_pad * 4
    if mode == "auto":
        resident_need = a_bytes + 8 * h_bytes + (12 << 20)
        mode = "resident" if resident_need <= vmem_cap else "streamed"

    if mode == "resident":
        out_t = dagnn_prop_resident(h0_t, a_t, w_s, b_s, K, C=C,
                                    vmem_cap=vmem_cap)
    else:
        out_t = dagnn_prop_streamed(h0_t, a_t, w_s, b_s, K, C=C,
                                    vmem_cap=vmem_cap, tc=tc)

    return out_t[:C, :N].T                                           # back to (N, C)


def dagnn_reference(x, edge_index, params, K, *, n_pad):
    """Pure-JAX reference with the same bf16 operand/carry quantization."""
    w1, b1, w2, b2, w_s, b_s = params
    N = x.shape[0]
    q = lambda v: v.astype(jnp.bfloat16).astype(jnp.float32)

    h = jnp.maximum(q(x) @ q(w1) + b1, 0.0)
    h = q(h) @ q(w2) + b2                                            # f32 H0

    a_q = build_a_hat_t(edge_index, N, n_pad)[:N, :N].astype(jnp.float32).T

    def score(hk):
        z = (hk * w_s[:, 0][None, :]).sum(axis=1, keepdims=True) + b_s[0]
        return jax.nn.sigmoid(z)

    acc = score(h) * h
    carry = q(h)                                  # bf16-carried H, matches kernels
    for _ in range(K):
        hk = a_q @ carry
        acc = acc + score(hk) * hk
        carry = q(hk)
    return acc


if __name__ == "__main__":
    # Deterministic small problem: N=300 nodes (pads to 512), in=16, hids=[32],
    # out=8, K=10.
    N, IN_C, HID, OUT_C, K = 300, 16, 32, 8, 10
    NUM_EDGES = 1200

    key = jax.random.PRNGKey(0)
    k_x, k_e1, k_e2, k_l1, k_l2, k_ls = jax.random.split(key, 6)

    x = jax.random.normal(k_x, (N, IN_C), jnp.float32)
    src = jax.random.randint(k_e1, (NUM_EDGES,), 0, N)
    dst = jax.random.randint(k_e2, (NUM_EDGES,), 0, N)
    edge_index = jnp.stack([src, dst], axis=0)                       # (2, E)

    w1, b1 = init_linear(k_l1, IN_C, HID)
    w2, b2 = init_linear(k_l2, HID, OUT_C)
    w_s, b_s = init_linear(k_ls, OUT_C, 1)
    params = (w1, b1, w2, b2, w_s, b_s)

    n_pad = _round_up(N, 512)

    # Force tc=128 on the streamed path so multi-panel streaming is exercised.
    out_streamed = jax.block_until_ready(
        dagnn_forward(x, edge_index, params, K, mode="streamed", tc=128))
    out_resident = jax.block_until_ready(
        dagnn_forward(x, edge_index, params, K, mode="resident"))
    out_auto = jax.block_until_ready(
        dagnn_forward(x, edge_index, params, K, mode="auto"))

    ref = dagnn_reference(x, edge_index, params, K, n_pad=n_pad)

    assert out_streamed.shape == (N, OUT_C)
    assert out_resident.shape == (N, OUT_C)
    for name, out in (("streamed", out_streamed),
                      ("resident", out_resident),
                      ("auto", out_auto)):
        err = float(jnp.max(jnp.abs(out - ref)))
        assert jnp.allclose(out, ref, atol=1e-2, rtol=1e-2), (name, err)

    print("KERNEL_OK")
</pallas_src>

<mosaic_0001>
module attributes {stable_mosaic.version = 11 : i64} {
  func.func @_mlp_kernel(%arg0: i32, %arg1: memref<16x512xbf16, #tpu.memory_space<vmem>>, %arg2: memref<32x16xbf16, #tpu.memory_space<vmem>>, %arg3: memref<32x1xf32, #tpu.memory_space<vmem>>, %arg4: memref<16x32xbf16, #tpu.memory_space<vmem>>, %arg5: memref<16x1xf32, #tpu.memory_space<vmem>>, %arg6: memref<16x512xf32, #tpu.memory_space<vmem>>) attributes {dimension_semantics = [#tpu.dimension_semantics<parallel>], iteration_bounds = array<i64: 1>, scalar_prefetch = 0 : i64, scratch_operands = 0 : i64, tpu.core_type = #tpu.core_type<tc>, window_params = [{transform_indices = @transform_0, window_bounds = array<i64: 16, 512>}, {pipeline_mode = #tpu.pipeline_mode<synchronous>, transform_indices = @transform_1, window_bounds = array<i64: 32, 16>}, {pipeline_mode = #tpu.pipeline_mode<synchronous>, transform_indices = @transform_2, window_bounds = array<i64: 32, 1>}, {pipeline_mode = #tpu.pipeline_mode<synchronous>, transform_indices = @transform_3, window_bounds = array<i64: 16, 32>}, {pipeline_mode = #tpu.pipeline_mode<synchronous>, transform_indices = @transform_4, window_bounds = array<i64: 16, 1>}, {transform_indices = @transform_5, window_bounds = array<i64: 16, 512>}]} {
    %c0 = arith.constant 0 : index
    %c0_0 = arith.constant 0 : index
    %0 = vector.load %arg2[%c0, %c0_0] : memref<32x16xbf16, #tpu.memory_space<vmem>>, vector<32x16xbf16>
    %c0_1 = arith.constant 0 : index
    %c0_2 = arith.constant 0 : index
    %1 = vector.load %arg1[%c0_1, %c0_2] : memref<16x512xbf16, #tpu.memory_space<vmem>>, vector<16x512xbf16>
    %cst = arith.constant dense<0.000000e+00> : vector<32x512xf32>
    %2 = tpu.matmul %0, %1, %cst {dimension_numbers = #tpu.dot_dimension_numbers<[1], [0], [0], [1], [0, 0, 1, 1], [], []>} : vector<32x16xbf16>, vector<16x512xbf16>, vector<32x512xf32> -> vector<32x512xf32>
    %c0_3 = arith.constant 0 : index
    %c0_4 = arith.constant 0 : index
    %3 = vector.load %arg3[%c0_3, %c0_4] : memref<32x1xf32, #tpu.memory_space<vmem>>, vector<32x1xf32>
    %4 = vector.broadcast %3 : vector<32x1xf32> to vector<32x512xf32>
    %5 = arith.addf %2, %4 : vector<32x512xf32>
    %cst_5 = arith.constant 0.000000e+00 : f32
    %6 = vector.broadcast %cst_5 : f32 to vector<32x512xf32>
    %7 = arith.maximumf %5, %6 : vector<32x512xf32>
    %c0_6 = arith.constant 0 : index
    %c0_7 = arith.constant 0 : index
    %8 = vector.load %arg4[%c0_6, %c0_7] : memref<16x32xbf16, #tpu.memory_space<vmem>>, vector<16x32xbf16>
    %9 = arith.truncf %7 : vector<32x512xf32> to vector<32x512xbf16>
    %cst_8 = arith.constant dense<0.000000e+00> : vector<16x512xf32>
    %10 = tpu.matmul %8, %9, %cst_8 {dimension_numbers = #tpu.dot_dimension_numbers<[1], [0], [0], [1], [0, 0, 1, 1], [], []>} : vector<16x32xbf16>, vector<32x512xbf16>, vector<16x512xf32> -> vector<16x512xf32>
    %c0_9 = arith.constant 0 : index
    %c0_10 = arith.constant 0 : index
    %11 = vector.load %arg5[%c0_9, %c0_10] : memref<16x1xf32, #tpu.memory_space<vmem>>, vector<16x1xf32>
    %12 = vector.broadcast %11 : vector<16x1xf32> to vector<16x512xf32>
    %13 = arith.addf %10, %12 : vector<16x512xf32>
    %c0_11 = arith.constant 0 : index
    %c0_12 = arith.constant 0 : index
    %14 = vector.load %arg6[%c0_11, %c0_12] : memref<16x512xf32, #tpu.memory_space<vmem>>, vector<16x512xf32>
    tpu.vector_store %arg6[%c0_11, %c0_12], %13 {strides = array<i32>} : memref<16x512xf32, #tpu.memory_space<vmem>>, vector<16x512xf32>,
    return
  }
  func.func @transform_0(%arg0: i32) -> (i32, i32) {
    %c0_i32 = arith.constant 0 : i32
    %c0_i32_0 = arith.constant 0 : i32
    return %c0_i32, %arg0 : i32, i32
  }
  func.func @transform_1(%arg0: i32) -> (i32, i32) {
    %c0_i32 = arith.constant 0 : i32
    %c0_i32_0 = arith.constant 0 : i32
    %c0_i32_1 = arith.constant 0 : i32
    return %c0_i32, %c0_i32_0 : i32, i32
  }
  func.func @transform_2(%arg0: i32) -> (i32, i32) {
    %c0_i32 = arith.constant 0 : i32
    %c0_i32_0 = arith.constant 0 : i32
    %c0_i32_1 = arith.constant 0 : i32
    return %c0_i32, %c0_i32_0 : i32, i32
  }
  func.func @transform_3(%arg0: i32) -> (i32, i32) {
    %c0_i32 = arith.constant 0 : i32
    %c0_i32_0 = arith.constant 0 : i32
    %c0_i32_1 = arith.constant 0 : i32
    return %c0_i32, %c0_i32_0 : i32, i32
  }
  func.func @transform_4(%arg0: i32) -> (i32, i32) {
    %c0_i32 = arith.constant 0 : i32
    %c0_i32_0 = arith.constant 0 : i32
    %c0_i32_1 = arith.constant 0 : i32
    return %c0_i32, %c0_i32_0 : i32, i32
  }
  func.func @transform_5(%arg0: i32) -> (i32, i32) {
    %c0_i32 = arith.constant 0 : i32
    %c0_i32_0 = arith.constant 0 : i32
    return %c0_i32, %arg0 : i32, i32
  }
}

</mosaic_0001>

<bundles_post_ra>
// kernel: tpu_custom_call.1
= control target key start
LH: loop header
LB: loop body
LE: loop exit
PB: predicated region body
PF: predicated region fallthrough
CT: control target
= control target key end

     0   :  { %v406_v2 = vmov 0   ;;  %vm84_vm0 = vcmask 130048   ;;  %s495_s0 = inlined_call_operand.vmem [shape: bf16[16,512], index: 0, kind: input, shape index: {}]   ;;  %s496_s1 = inlined_call_operand.vmem [shape: bf16[32,16], index: 1, kind: input, shape index: {}]   ;;  %s497_s2 = inlined_call_operand.vmem [shape: f32[32,1], index: 2, kind: input, shape index: {}]   ;;  %s498_s3 = inlined_call_operand.vmem [shape: bf16[16,32], index: 3, kind: input, shape index: {}]   ;;  %s499_s4 = inlined_call_operand.vmem [shape: f32[16,1], index: 4, kind: input, shape index: {}]   ;;  %s500_s5 = inlined_call_operand.hbm [shape: f32[16,512], index: 5, kind: output, shape index: {}]  }
   0x1   :  { %v373_v0 = vld [vmem:[%s495_s0 + $0x4] ss:$16 sps:$4 sm:$0xff]   ;;  %v375_v1 = vld [vmem:[%s495_s0 + $0xc] ss:$16 sps:$4 sm:$0xff]   ;;  %123 = vmatprep.mubr.bf16.mxu0 %v406_v2  ;;  %176 = vmatprep.mubr.bf16.mxu1 %v406_v2  ;;  %v377_v3 = vld [vmem:[%s495_s0] ss:$16 sps:$4 sm:$0xff]  }
   0x2   :  { %91 = vmatprep.subr.bf16.mxu0 %v373_v0  ;;  %v378_v4 = vld [vmem:[%s495_s0 + $0x8] ss:$16 sps:$4 sm:$0xff]   ;;  %371 = vset.pattern.permute.xlu0 %v406_v2  ;;  %v379_v5 = vld [vmem:[%s496_s1] sm:$0xff]   ;;  %v32_v7 = vld [vmem:[%s497_s2 + $0x10] sm:$0xff] }
   0x3   :  { %144 = vmatprep.subr.bf16.mxu1 %v375_v1  ;;  %372 = vset.pattern.permute.xlu1 %v406_v2  ;;  %v30_v6 = vld [vmem:[%s497_s2] sm:$0xff]  ;;  %v31_v8 = vld [vmem:[%s497_s2 + $0x8] sm:$0xff]  ;;  %v33_v9 = vld [vmem:[%s497_s2 + $0x18] sm:$0xff] }
   0x4   :  { %92 = vmatpush1.bf16.msra.mxu0 %v377_v3  ;;  %145 = vmatpush1.bf16.msra.mxu1 %v378_v4 }
   0x5   :  { %36 = vperm.xlu0 %371, %v30_v6   ;;  %46 = vperm.xlu1 %372, %v32_v7  }
   0x7   :  { %360 = vmatmul.mubr.msk.bf16.vlgmr.msra.gmra.mrb[0].mxu0 %vm84_vm0, %v379_v5  ;;  %362 = vmatmul.mubr.msk.bf16.vlgmr.msra.gmra.mrb[0].mxu1 %vm84_vm0, %v379_v5 }
   0x8   :  { %10 = vsyncpa [#allocation3], 0  ;;  %133 = vmatprep.mubr.bf16.mxu0 %v406_v2  ;;  %186 = vmatprep.mubr.bf16.mxu1 %v406_v2  ;;  %v223_v10 = vld [vmem:[%s499_s4] sm:$0xff]  ;;  %v380_v11 = vld [vmem:[%s496_s1 + $0x8] sm:$0xff]   ;;  %vm240_vm1 = vcmask 261120  }
   0x9   :  { %41 = vperm.xlu0 %371, %v31_v8   ;;  %51 = vperm.xlu1 %372, %v33_v9   ;;  %v224_v12 = vld [vmem:[%s499_s4 + $0x8] sm:$0xff]  ;;  %v381_v9 = vld [vmem:[%s498_s3] sm:$0xff]   ;;  %s407_s4 = smov [#allocation2]  }
   0xa   :  { %s343_s16 = sshll.u32 %s407_s4, 4  ;;  %s344_s16 = int_to_ptr.vmem [resolvable:$true] %s343_s16 }
   0xb   :  { %s382_s3 = scalar_lea.vmem %s344_s16, 1024  ;;  %p387_p1 = scmp.lt.s32.totalorder %s344_s16, %s344_s16 }
   0xc   :  { %p383_p0 = scmp.ne.s32.totalorder %s344_s16, %s382_s3  ;;  %p388_p2 = scmp.lt.s32.totalorder %s382_s3, %s382_s3 }
   0xd   :  { %227 = vperm.xlu0 %371, %v223_v10   ;;  %232 = vperm.xlu1 %372, %v224_v12  }
   0xe   :  { %p389_p3 = por %p388_p2, %p387_p1 }
   0xf   :  { %361 = vmatmul.mubr.msk.bf16.gmra.mrb[4].mxu0 %vm84_vm0, %v380_v11  ;;  %363 = vmatmul.mubr.msk.bf16.gmra.mrb[4].mxu1 %vm84_vm0, %v380_v11 }
  0x10   :  { %276 = vmatprep.mubr.bf16.mxu0 %v406_v2  ;;  %319 = vmatprep.mubr.bf16.mxu1 %v406_v2  ;;  %p390_p4 = pnand %p389_p3, %p383_p0 }
  0x84   :  { %v37_v13 = vpop.permute.xlu0 %36  ;;  %v47_v15 = vpop.permute.xlu1 %46 }
  0x88   :  { %v42_v14 = vpop.permute.xlu0 %41  ;;  %v52_v42 = vpop.permute.xlu1 %51 }
  0x8c   :  { %v228_v10 = vpop.permute.xlu0 %227  ;;  %v233_v11 = vpop.permute.xlu1 %232 }
  0xda   :  { %v125_v16 = vpop.f32.mrb[0].mxu0  ;;  %v178_v17 = vpop.f32.mrb[0].mxu1 }
  0xdb   :  { %v126_v18 = vadd.f32 %v125_v16, %v37_v13  ;;  %v179_v19 = vadd.f32 %v178_v17, %v37_v13  ;;  %v127_v20 = vpop.f32.mrb[1].mxu0  ;;  %v180_v21 = vpop.f32.mrb[1].mxu1 }
  0xdc   :  { %v128_v22 = vadd.f32 %v127_v20, %v37_v13  ;;  %v181_v23 = vadd.f32 %v180_v21, %v37_v13  ;;  %v129_v24 = vpop.f32.mrb[2].mxu0  ;;  %v182_v25 = vpop.f32.mrb[2].mxu1 }
  0xdd   :  { %v130_v26 = vadd.f32 %v129_v24, %v42_v14  ;;  %v183_v27 = vadd.f32 %v182_v25, %v42_v14  ;;  %v131_v28 = vpop.f32.mrb[3].mxu0  ;;  %v184_v29 = vpop.f32.mrb[3].mxu1  ;;  %v197_v32 = vmax.f32 %v126_v18, 0.0  ;;  %v199_v33 = vmax.f32 %v179_v19, 0.0 }
  0xde   :  { %v132_v30 = vadd.f32 %v131_v28, %v42_v14  ;;  %v185_v31 = vadd.f32 %v184_v29, %v42_v14  ;;  %v198_v36 = vmax.f32 %v128_v22, 0.0  ;;  %v200_v37 = vmax.f32 %v181_v23, 0.0 }
  0xdf   :  { %v201_v34 = vmax.f32 %v130_v26, 0.0  ;;  %v203_v35 = vmax.f32 %v183_v27, 0.0 }
  0xe0   :  { %v202_v38 = vmax.f32 %v132_v30, 0.0  ;;  %v204_v39 = vmax.f32 %v185_v31, 0.0 }
  0xe1   :  { %v215_v40 = vpack.c.bf16 %v201_v34, %v197_v32  ;;  %v217_v41 = vpack.c.bf16 %v203_v35, %v199_v33 }
  0xe2   :  { %v216_v43 = vpack.c.bf16 %v202_v38, %v198_v36  ;;  %v218_v44 = vpack.c.bf16 %v204_v39, %v200_v37  ;;  %v135_v45 = vpop.f32.mrb[4].mxu0  ;;  %v188_v46 = vpop.f32.mrb[4].mxu1 }
  0xe3   :  { %v136_v47 = vadd.f32 %v135_v45, %v47_v15  ;;  %v189_v48 = vadd.f32 %v188_v46, %v47_v15  ;;  %v137_v49 = vpop.f32.mrb[5].mxu0  ;;  %v190_v50 = vpop.f32.mrb[5].mxu1 }
  0xe4   :  { %v138_v51 = vadd.f32 %v137_v49, %v47_v15  ;;  %v191_v52 = vadd.f32 %v190_v50, %v47_v15  ;;  %v139_v53 = vpop.f32.mrb[6].mxu0  ;;  %v192_v54 = vpop.f32.mrb[6].mxu1  ;;  %244 = vmatprep.subr.bf16.mxu0 %v216_v43  ;;  %287 = vmatprep.subr.bf16.mxu1 %v218_v44 }
  0xe5   :  { %v140_v55 = vadd.f32 %v139_v53, %v52_v42  ;;  %v193_v56 = vadd.f32 %v192_v54, %v52_v42  ;;  %v141_v57 = vpop.f32.mrb[7].mxu0  ;;  %v194_v58 = vpop.f32.mrb[7].mxu1  ;;  %245 = vmatpush1.bf16.msra.mxu0 %v215_v40  ;;  %288 = vmatpush1.bf16.msra.mxu1 %v217_v41  ;;  %v205_v61 = vmax.f32 %v136_v47, 0.0  ;;  %v207_v62 = vmax.f32 %v189_v48, 0.0 }
  0xe6   :  { %v142_v59 = vadd.f32 %v141_v57, %v52_v42  ;;  %v195_v60 = vadd.f32 %v194_v58, %v52_v42  ;;  %v206_v1 = vmax.f32 %v138_v51, 0.0  ;;  %v208_v2 = vmax.f32 %v191_v52, 0.0 }
  0xe7   :  { %v209_v63 = vmax.f32 %v140_v55, 0.0  ;;  %v211_v0 = vmax.f32 %v193_v56, 0.0 }
  0xe8   :  { %v210_v3 = vmax.f32 %v142_v59, 0.0  ;;  %v212_v4 = vmax.f32 %v195_v60, 0.0 }
  0xe9   :  { %v219_v5 = vpack.c.bf16 %v209_v63, %v205_v61  ;;  %v221_v6 = vpack.c.bf16 %v211_v0, %v207_v62 }
  0xea   :  { %v220_v7 = vpack.c.bf16 %v210_v3, %v206_v1  ;;  %v222_v8 = vpack.c.bf16 %v212_v4, %v208_v2 }
  0xec   :  { %246 = vmatprep.subr.bf16.mxu0 %v220_v7  ;;  %289 = vmatprep.subr.bf16.mxu1 %v222_v8 }
  0xed   :  { %247 = vmatpush1.bf16.msra.mxu0 %v219_v5  ;;  %290 = vmatpush1.bf16.msra.mxu1 %v221_v6 }
  0xf0   :  { %365 = vmatmul.mubr.msk.bf16.vlgmr.msra.gmra.mrb[8].mxu0 %vm240_vm1, %v381_v9  ;;  %366 = vmatmul.mubr.msk.bf16.vlgmr.msra.gmra.mrb[8].mxu1 %vm240_vm1, %v381_v9 }
 0x1c3   :  { %v278_v12 = vpop.f32.mrb[8].mxu0  ;;  %v321_v13 = vpop.f32.mrb[8].mxu1 }
 0x1c4   :  { %v279_v14 = vadd.f32 %v278_v12, %v228_v10  ;;  %v322_v15 = vadd.f32 %v321_v13, %v228_v10  ;;  %v280_v16 = vpop.f32.mrb[9].mxu0  ;;  %v323_v17 = vpop.f32.mrb[9].mxu1 }
 0x1c5   :  { %v281_v18 = vadd.f32 %v280_v16, %v228_v10  ;;  %v324_v19 = vadd.f32 %v323_v17, %v228_v10  ;;  %v282_v20 = vpop.f32.mrb[10].mxu0  ;;  %v325_v21 = vpop.f32.mrb[10].mxu1 }
 0x1c6   :  { %330 = vst [vmem:[#allocation2] sm:$0xff] %v279_v14  ;;  %332 = vst [vmem:[#allocation2 + $0x10] sm:$0xff] %v322_v15  ;;  %v283_v22 = vadd.f32 %v282_v20, %v233_v11  ;;  %v326_v23 = vadd.f32 %v325_v21, %v233_v11  ;;  %v284_v24 = vpop.f32.mrb[11].mxu0  ;;  %v327_v25 = vpop.f32.mrb[11].mxu1 }
 0x1c7   :  { %331 = vst [vmem:[#allocation2 + $0x8] sm:$0xff] %v281_v18  ;;  %333 = vst [vmem:[#allocation2 + $0x18] sm:$0xff] %v324_v19  ;;  %v285_v26 = vadd.f32 %v284_v24, %v233_v11  ;;  %v328_v27 = vadd.f32 %v327_v25, %v233_v11 }
 0x1c8   :  { %334 = vst [vmem:[#allocation2 + $0x20] sm:$0xff] %v283_v22  ;;  %336 = vst [vmem:[#allocation2 + $0x30] sm:$0xff] %v326_v23 }
 0x1c9   :  { %335 = vst [vmem:[#allocation2 + $0x28] sm:$0xff] %v285_v26  ;;  %337 = vst [vmem:[#allocation2 + $0x38] sm:$0xff] %v328_v27 }
 0x1ca   :  { %393 = shalt.err (!%p390_p4)
}
 0x1cb   :  { %s394_s19 = scalar_lea.hbm %s500_s5, 1024 }
 0x1cc   :  { %p395_p5 = scmp.ne.s32.totalorder %s500_s5, %s394_s19  ;;  %p398_p6 = scmp.lt.u32.totalorder %s394_s19, %s500_s5 }
 0x1ce   :  { %p400_p7 = pnand %p398_p6, %p395_p5 }
 0x1d0   :  { %403 = shalt.err (!%p400_p7)
}
 0x1d1   :  { %s408_s24 = smov 512   ;;  %s409_s25 = smov 32  }
 0x1d2   :  { %349 = dma.vmem_to_hbm [thread:$0]  %s344_s16, 1024, %s500_s5, [#allocation3], %s408_s24, %s408_s24, %s409_s25  }
 0x1d3   :  { %404 = dma.done.wait [#allocation3], 1024  }
 0x1d4   :  { %405 = vsyncadd [#allocation3], 4294966272 }
 0x1d5   :  { %353 = vsyncpa [#allocation3], 1 }

</bundles_post_ra>
